<compile_context>
chip_gen: v5e
topology: v5e:2x2
jax: 0.10.0
libtpu: 0.0.40
codegen_flags: <defaults>
</compile_context>

<pallas_src>
import jax
import jax.numpy as jnp
from jax.experimental import pallas as pl
from jax.experimental.pallas import tpu as pltpu

HIDDEN = 128


def critic_kernel(x_ref,                  # (TM, obs_dim+act_dim) bf16
                  win_ref,                # (obs_dim+act_dim, 256) bf16 block-diag
                  b1_ref, b2_ref,         # (1, 128) f32
                  w2h_ref,                # (128, 128) bf16
                  w3_ref, b3_ref,         # (128, 128) bf16 / (1, 128) f32
                  w4_ref, b4_ref,         # (1, 128) f32 / (1, 1) f32
                  out_ref):               # (TM, 1) f32
    # Fused FC1 + FC2-acts matmul: one MXU pass with N=256.
    fused = jnp.dot(x_ref[...], win_ref[...],
                    preferred_element_type=jnp.float32)        # (TM, 256) f32
    h1 = jnp.maximum(fused[:, :HIDDEN] + b1_ref[...], 0.0)      # relu(obs@W1 + b1)
    a2 = fused[:, HIDDEN:]                                      # acts @ W2a

    # FC2 over concat([h1, acts]) == h1 @ W2h + acts @ W2a, then relu.
    h2 = jnp.dot(h1.astype(jnp.bfloat16), w2h_ref[...],
                 preferred_element_type=jnp.float32) + a2 + b2_ref[...]
    h2 = jnp.maximum(h2, 0.0)

    # FC3 + relu.
    h3 = jnp.dot(h2.astype(jnp.bfloat16), w3_ref[...],
                 preferred_element_type=jnp.float32)
    h3 = jnp.maximum(h3 + b3_ref[...], 0.0)

    # FC4 (128 -> 1) as multiply + lane reduce (VPU/XLU); narrow f32 store.
    out_ref[...] = (jnp.sum(h3 * w4_ref[...], axis=-1, keepdims=True)
                    + b4_ref[...])


def _round_up(x, m):
    return ((x + m - 1) // m) * m


def _choose_tile(batch, tm):
    """Pick the batch-tile size.

    * Round batch up to a multiple of 16 (bf16 sublane packing).
    * Small batches: a single maximal tile (per-step overhead dominates).
    * Batches >= 512 rows that would fit one tile are split in two so both
      v7x TensorCores get a grid step on the "parallel" axis.
    * Large batches: cap at `tm` (keeps intermediates to a few MiB of VMEM).
    """
    b16 = _round_up(batch, 16)
    if b16 > tm:
        return tm
    if b16 >= 512:
        return _round_up((b16 + 1) // 2, 16)
    return b16


def critic_forward(obs, acts, params, *, tm=2048):
    """obs: (B, obs_dim) f32, acts: (B, act_dim) f32 -> (B, 1) f32."""
    B, obs_dim = obs.shape
    act_dim = acts.shape[1]
    in_dim = obs_dim + act_dim
    H = HIDDEN

    tm_eff = _choose_tile(B, tm)
    Bp = _round_up(B, tm_eff)

    # Single fused XLA op: concat + bf16 cast + pad (one HBM intermediate).
    x = jnp.pad(jnp.concatenate([obs, acts], axis=1).astype(jnp.bfloat16),
                ((0, Bp - B), (0, 0)))

    resident = lambda shape: pl.BlockSpec(shape, lambda i: (0, 0))

    out = pl.pallas_call(
        critic_kernel,
        out_shape=jax.ShapeDtypeStruct((Bp, 1), jnp.float32),
        grid=(Bp // tm_eff,),
        in_specs=[
            pl.BlockSpec((tm_eff, in_dim), lambda i: (i, 0)),  # [obs|acts] tile
            resident((in_dim, 2 * H)),                         # W_in block-diag
            resident((1, H)),                                  # b1
            resident((1, H)),                                  # b2
            resident((H, H)),                                  # W2h
            resident((H, H)),                                  # W3
            resident((1, H)),                                  # b3
            resident((1, H)),                                  # w4 row vector
            resident((1, 1)),                                  # b4
        ],
        out_specs=pl.BlockSpec((tm_eff, 1), lambda i: (i, 0)),
        # VMEM stays well under the default scoped limit on v5e/v6e/v7x even
        # at TM=2048, so no vmem_limit_bytes override is needed.
        compiler_params=pltpu.CompilerParams(
            dimension_semantics=("parallel",)),
    )(x, params["w_in"], params["b1"], params["b2"],
      params["w2h"], params["w3"], params["b3"],
      params["w4"], params["b4"])

    # Only drops padded rows of a (Bp, 1) array — negligible re-read.
    return out[:B]


def init_params(key, obs_dim, act_dim, hidden=HIDDEN):
    """Matches torch.nn.Linear init U(-1/sqrt(fan_in), +1/sqrt(fan_in)).

    Layout (weights transposed to (in_features, out_features)):
      w_in : (obs_dim+act_dim, 2*hidden) bf16, block-diag [[W1, 0], [0, W2a]]
      w2h  : (hidden, hidden) bf16  (FC2 rows that multiply h1)
      w3   : (hidden, hidden) bf16
      w4   : (1, hidden) f32        (FC4 as a row vector; multiply+lane-reduce)
      b1,b2,b3 : (1, hidden) f32 ;  b4 : (1, 1) f32
    """
    def linear(k, fan_in, fan_out):
        kw, kb = jax.random.split(k)
        bound = 1.0 / jnp.sqrt(fan_in)
        w = jax.random.uniform(kw, (fan_in, fan_out), jnp.float32, -bound, bound)
        b = jax.random.uniform(kb, (1, fan_out), jnp.float32, -bound, bound)
        return w, b

    k1, k2, k3, k4 = jax.random.split(key, 4)
    w1, b1 = linear(k1, obs_dim, hidden)
    w2, b2 = linear(k2, hidden + act_dim, hidden)
    w3, b3 = linear(k3, hidden, hidden)
    w4, b4 = linear(k4, hidden, 1)

    in_dim = obs_dim + act_dim
    w_in = jnp.zeros((in_dim, 2 * hidden), jnp.float32)
    w_in = w_in.at[:obs_dim, :hidden].set(w1)            # obs  @ W1  -> cols 0:128
    w_in = w_in.at[obs_dim:, hidden:].set(w2[hidden:])   # acts @ W2a -> cols 128:256

    bf = jnp.bfloat16
    return {
        "w_in": w_in.astype(bf),
        "b1": b1, "b2": b2,
        "w2h": w2[:hidden].astype(bf),
        "w3": w3.astype(bf), "b3": b3,
        "w4": w4.reshape(1, hidden),    # keep f32 (applied on VPU/XLU)
        "b4": b4.reshape(1, 1),
    }


def critic_ref(obs, acts, params):
    """Pure-JAX reference using the same operand dtypes / accumulation."""
    x = jnp.concatenate([obs, acts], axis=1).astype(jnp.bfloat16)
    fused = jnp.dot(x, params["w_in"], preferred_element_type=jnp.float32)
    h1 = jax.nn.relu(fused[:, :HIDDEN] + params["b1"])
    h2 = jax.nn.relu(jnp.dot(h1.astype(jnp.bfloat16), params["w2h"],
                             preferred_element_type=jnp.float32)
                     + fused[:, HIDDEN:] + params["b2"])
    h3 = jax.nn.relu(jnp.dot(h2.astype(jnp.bfloat16), params["w3"],
                             preferred_element_type=jnp.float32) + params["b3"])
    return jnp.sum(h3 * params["w4"], axis=-1, keepdims=True) + params["b4"]


if __name__ == "__main__":
    # Small MADDPG-style setup: n_agent=2, dim_observation=16, dim_action=8,
    # dim_same=True  ->  obs_dim = 32, act_dim = 16.
    n_agent, dim_observation, dim_action = 2, 16, 8
    obs_dim = dim_observation * n_agent
    act_dim = dim_action * n_agent

    key = jax.random.PRNGKey(0)
    k_obs, k_acts, k_params = jax.random.split(key, 3)
    params = init_params(k_params, obs_dim, act_dim)

    # Small batch -> single-tile grid.
    batch = 8
    obs = jax.random.normal(k_obs, (batch, obs_dim), jnp.float32)
    acts = jax.random.normal(k_acts, (batch, act_dim), jnp.float32)
    out = jax.block_until_ready(critic_forward(obs, acts, params))
    ref = critic_ref(obs, acts, params)
    assert out.shape == (batch, 1)
    # bf16 MXU operands -> loosened tolerance vs. pure-f32 math.
    assert jnp.allclose(out, ref, atol=2e-2, rtol=2e-2), (out, ref)

    # Larger batch -> exercises padding + the >=2-step "parallel" grid path.
    batch2 = 600
    k_obs2, k_acts2 = jax.random.split(jax.random.PRNGKey(1))
    obs2 = jax.random.normal(k_obs2, (batch2, obs_dim), jnp.float32)
    acts2 = jax.random.normal(k_acts2, (batch2, act_dim), jnp.float32)
    out2 = jax.block_until_ready(critic_forward(obs2, acts2, params))
    ref2 = critic_ref(obs2, acts2, params)
    assert out2.shape == (batch2, 1)
    assert jnp.allclose(out2, ref2, atol=2e-2, rtol=2e-2)

    print("KERNEL_OK")
</pallas_src>

<mosaic_0001>
module attributes {stable_mosaic.version = 11 : i64} {
  func.func @critic_kernel(%arg0: i32, %arg1: memref<16x48xbf16, #tpu.memory_space<vmem>>, %arg2: memref<48x256xbf16, #tpu.memory_space<vmem>>, %arg3: memref<1x128xf32, #tpu.memory_space<vmem>>, %arg4: memref<1x128xf32, #tpu.memory_space<vmem>>, %arg5: memref<128x128xbf16, #tpu.memory_space<vmem>>, %arg6: memref<128x128xbf16, #tpu.memory_space<vmem>>, %arg7: memref<1x128xf32, #tpu.memory_space<vmem>>, %arg8: memref<1x128xf32, #tpu.memory_space<vmem>>, %arg9: memref<1x1xf32, #tpu.memory_space<vmem>>, %arg10: memref<16x1xf32, #tpu.memory_space<vmem>>) attributes {dimension_semantics = [#tpu.dimension_semantics<parallel>], iteration_bounds = array<i64: 1>, scalar_prefetch = 0 : i64, scratch_operands = 0 : i64, tpu.core_type = #tpu.core_type<tc>, window_params = [{transform_indices = @transform_0, window_bounds = array<i64: 16, 48>}, {pipeline_mode = #tpu.pipeline_mode<synchronous>, transform_indices = @transform_1, window_bounds = array<i64: 48, 256>}, {pipeline_mode = #tpu.pipeline_mode<synchronous>, transform_indices = @transform_2, window_bounds = array<i64: 1, 128>}, {pipeline_mode = #tpu.pipeline_mode<synchronous>, transform_indices = @transform_3, window_bounds = array<i64: 1, 128>}, {pipeline_mode = #tpu.pipeline_mode<synchronous>, transform_indices = @transform_4, window_bounds = array<i64: 128, 128>}, {pipeline_mode = #tpu.pipeline_mode<synchronous>, transform_indices = @transform_5, window_bounds = array<i64: 128, 128>}, {pipeline_mode = #tpu.pipeline_mode<synchronous>, transform_indices = @transform_6, window_bounds = array<i64: 1, 128>}, {pipeline_mode = #tpu.pipeline_mode<synchronous>, transform_indices = @transform_7, window_bounds = array<i64: 1, 128>}, {pipeline_mode = #tpu.pipeline_mode<synchronous>, transform_indices = @transform_8, window_bounds = array<i64: 1, 1>}, {transform_indices = @transform_9, window_bounds = array<i64: 16, 1>}]} {
    %c0 = arith.constant 0 : index
    %c0_0 = arith.constant 0 : index
    %0 = vector.load %arg1[%c0, %c0_0] : memref<16x48xbf16, #tpu.memory_space<vmem>>, vector<16x48xbf16>
    %c0_1 = arith.constant 0 : index
    %c0_2 = arith.constant 0 : index
    %1 = vector.load %arg2[%c0_1, %c0_2] : memref<48x256xbf16, #tpu.memory_space<vmem>>, vector<48x256xbf16>
    %cst = arith.constant dense<0.000000e+00> : vector<16x256xf32>
    %2 = tpu.matmul %0, %1, %cst {dimension_numbers = #tpu.dot_dimension_numbers<[1], [0], [0], [1], [0, 0, 1, 1], [], []>} : vector<16x48xbf16>, vector<48x256xbf16>, vector<16x256xf32> -> vector<16x256xf32>
    %3 = vector.extract_strided_slice %2 {offsets = [0, 0], sizes = [16, 128], strides = [1, 1]} : vector<16x256xf32> to vector<16x128xf32>
    %c0_3 = arith.constant 0 : index
    %c0_4 = arith.constant 0 : index
    %4 = vector.load %arg3[%c0_3, %c0_4] : memref<1x128xf32, #tpu.memory_space<vmem>>, vector<1x128xf32>
    %5 = vector.broadcast %4 : vector<1x128xf32> to vector<16x128xf32>
    %6 = arith.addf %3, %5 : vector<16x128xf32>
    %cst_5 = arith.constant 0.000000e+00 : f32
    %7 = vector.broadcast %cst_5 : f32 to vector<16x128xf32>
    %8 = arith.maximumf %6, %7 : vector<16x128xf32>
    %9 = vector.extract_strided_slice %2 {offsets = [0, 128], sizes = [16, 128], strides = [1, 1]} : vector<16x256xf32> to vector<16x128xf32>
    %10 = arith.truncf %8 : vector<16x128xf32> to vector<16x128xbf16>
    %c0_6 = arith.constant 0 : index
    %c0_7 = arith.constant 0 : index
    %11 = vector.load %arg5[%c0_6, %c0_7] : memref<128x128xbf16, #tpu.memory_space<vmem>>, vector<128x128xbf16>
    %cst_8 = arith.constant dense<0.000000e+00> : vector<16x128xf32>
    %12 = tpu.matmul %10, %11, %cst_8 {dimension_numbers = #tpu.dot_dimension_numbers<[1], [0], [0], [1], [0, 0, 1, 1], [], []>} : vector<16x128xbf16>, vector<128x128xbf16>, vector<16x128xf32> -> vector<16x128xf32>
    %13 = arith.addf %12, %9 : vector<16x128xf32>
    %c0_9 = arith.constant 0 : index
    %c0_10 = arith.constant 0 : index
    %14 = vector.load %arg4[%c0_9, %c0_10] : memref<1x128xf32, #tpu.memory_space<vmem>>, vector<1x128xf32>
    %15 = vector.broadcast %14 : vector<1x128xf32> to vector<16x128xf32>
    %16 = arith.addf %13, %15 : vector<16x128xf32>
    %cst_11 = arith.constant 0.000000e+00 : f32
    %17 = vector.broadcast %cst_11 : f32 to vector<16x128xf32>
    %18 = arith.maximumf %16, %17 : vector<16x128xf32>
    %19 = arith.truncf %18 : vector<16x128xf32> to vector<16x128xbf16>
    %c0_12 = arith.constant 0 : index
    %c0_13 = arith.constant 0 : index
    %20 = vector.load %arg6[%c0_12, %c0_13] : memref<128x128xbf16, #tpu.memory_space<vmem>>, vector<128x128xbf16>
    %cst_14 = arith.constant dense<0.000000e+00> : vector<16x128xf32>
    %21 = tpu.matmul %19, %20, %cst_14 {dimension_numbers = #tpu.dot_dimension_numbers<[1], [0], [0], [1], [0, 0, 1, 1], [], []>} : vector<16x128xbf16>, vector<128x128xbf16>, vector<16x128xf32> -> vector<16x128xf32>
    %c0_15 = arith.constant 0 : index
    %c0_16 = arith.constant 0 : index
    %22 = vector.load %arg7[%c0_15, %c0_16] : memref<1x128xf32, #tpu.memory_space<vmem>>, vector<1x128xf32>
    %23 = vector.broadcast %22 : vector<1x128xf32> to vector<16x128xf32>
    %24 = arith.addf %21, %23 : vector<16x128xf32>
    %cst_17 = arith.constant 0.000000e+00 : f32
    %25 = vector.broadcast %cst_17 : f32 to vector<16x128xf32>
    %26 = arith.maximumf %24, %25 : vector<16x128xf32>
    %c0_18 = arith.constant 0 : index
    %c0_19 = arith.constant 0 : index
    %27 = vector.load %arg8[%c0_18, %c0_19] : memref<1x128xf32, #tpu.memory_space<vmem>>, vector<1x128xf32>
    %28 = vector.broadcast %27 : vector<1x128xf32> to vector<16x128xf32>
    %29 = arith.mulf %26, %28 : vector<16x128xf32>
    %cst_20 = arith.constant dense<0.000000e+00> : vector<16xf32>
    %30 = vector.multi_reduction <add>, %29, %cst_20 [1] : vector<16x128xf32> to vector<16xf32>
    %31 = vector.shape_cast %30 : vector<16xf32> to vector<16x1xf32>
    %c0_21 = arith.constant 0 : index
    %c0_22 = arith.constant 0 : index
    %32 = vector.load %arg9[%c0_21, %c0_22] : memref<1x1xf32, #tpu.memory_space<vmem>>, vector<1x1xf32>
    %33 = vector.broadcast %32 : vector<1x1xf32> to vector<16x1xf32>
    %34 = arith.addf %31, %33 : vector<16x1xf32>
    %c0_23 = arith.constant 0 : index
    %c0_24 = arith.constant 0 : index
    %35 = vector.load %arg10[%c0_23, %c0_24] : memref<16x1xf32, #tpu.memory_space<vmem>>, vector<16x1xf32>
    tpu.vector_store %arg10[%c0_23, %c0_24], %34 {strides = array<i32>} : memref<16x1xf32, #tpu.memory_space<vmem>>, vector<16x1xf32>,
    return
  }
  func.func @transform_0(%arg0: i32) -> (i32, i32) {
    %c0_i32 = arith.constant 0 : i32
    %c0_i32_0 = arith.constant 0 : i32
    return %arg0, %c0_i32 : i32, i32
  }
  func.func @transform_1(%arg0: i32) -> (i32, i32) {
    %c0_i32 = arith.constant 0 : i32
    %c0_i32_0 = arith.constant 0 : i32
    %c0_i32_1 = arith.constant 0 : i32
    return %c0_i32, %c0_i32_0 : i32, i32
  }
  func.func @transform_2(%arg0: i32) -> (i32, i32) {
    %c0_i32 = arith.constant 0 : i32
    %c0_i32_0 = arith.constant 0 : i32
    %c0_i32_1 = arith.constant 0 : i32
    return %c0_i32, %c0_i32_0 : i32, i32
  }
  func.func @transform_3(%arg0: i32) -> (i32, i32) {
    %c0_i32 = arith.constant 0 : i32
    %c0_i32_0 = arith.constant 0 : i32
    %c0_i32_1 = arith.constant 0 : i32
    return %c0_i32, %c0_i32_0 : i32, i32
  }
  func.func @transform_4(%arg0: i32) -> (i32, i32) {
    %c0_i32 = arith.constant 0 : i32
    %c0_i32_0 = arith.constant 0 : i32
    %c0_i32_1 = arith.constant 0 : i32
    return %c0_i32, %c0_i32_0 : i32, i32
  }
  func.func @transform_5(%arg0: i32) -> (i32, i32) {
    %c0_i32 = arith.constant 0 : i32
    %c0_i32_0 = arith.constant 0 : i32
    %c0_i32_1 = arith.constant 0 : i32
    return %c0_i32, %c0_i32_0 : i32, i32
  }
  func.func @transform_6(%arg0: i32) -> (i32, i32) {
    %c0_i32 = arith.constant 0 : i32
    %c0_i32_0 = arith.constant 0 : i32
    %c0_i32_1 = arith.constant 0 : i32
    return %c0_i32, %c0_i32_0 : i32, i32
  }
  func.func @transform_7(%arg0: i32) -> (i32, i32) {
    %c0_i32 = arith.constant 0 : i32
    %c0_i32_0 = arith.constant 0 : i32
    %c0_i32_1 = arith.constant 0 : i32
    return %c0_i32, %c0_i32_0 : i32, i32
  }
  func.func @transform_8(%arg0: i32) -> (i32, i32) {
    %c0_i32 = arith.constant 0 : i32
    %c0_i32_0 = arith.constant 0 : i32
    %c0_i32_1 = arith.constant 0 : i32
    return %c0_i32, %c0_i32_0 : i32, i32
  }
  func.func @transform_9(%arg0: i32) -> (i32, i32) {
    %c0_i32 = arith.constant 0 : i32
    %c0_i32_0 = arith.constant 0 : i32
    return %arg0, %c0_i32 : i32, i32
  }
}

</mosaic_0001>

<bundles_post_ra>
// kernel: tpu_custom_call.1
= control target key start
LH: loop header
LB: loop body
LE: loop exit
PB: predicated region body
PF: predicated region fallthrough
CT: control target
= control target key end

     0   :  { %s704_s0 = inlined_call_operand.hbm [shape: bf16[16,48], index: 0, kind: input, shape index: {}]   ;;  %s705_s1 = inlined_call_operand.hbm [shape: bf16[48,256], index: 1, kind: input, shape index: {}]   ;;  %s706_s2 = inlined_call_operand.vmem [shape: f32[1,128], index: 2, kind: input, shape index: {}]   ;;  %s707_s3 = inlined_call_operand.vmem [shape: f32[1,128], index: 3, kind: input, shape index: {}]   ;;  %s708_s4 = inlined_call_operand.hbm [shape: bf16[128,128], index: 4, kind: input, shape index: {}]   ;;  %s709_s5 = inlined_call_operand.hbm [shape: bf16[128,128], index: 5, kind: input, shape index: {}]   ;;  %s710_s6 = inlined_call_operand.vmem [shape: f32[1,128], index: 6, kind: input, shape index: {}]   ;;  %s711_s7 = inlined_call_operand.vmem [shape: f32[1,128], index: 7, kind: input, shape index: {}]   ;;  %s712_s8 = inlined_call_operand.<no memory space> [shape: f32[1,1], index: 8, kind: input, shape index: {}]   ;;  %s713_s9 = inlined_call_operand.vmem [shape: f32[16,1], index: 9, kind: output, shape index: {}]  }
   0x1   :  { %v14_v0 = vstv %s712_s8 }
   0x2   :  { %15 = vst [vmem:[#allocation2] sm:$0x1] %v14_v0 }
   0x3   :  { %16 = vsyncpa [#allocation4], 0 }
   0x4   :  { %17 = vsyncpa [#allocation6], 0  ;;  %s36_s13 = sshll.u32 %s705_s1, 4  ;;  %s37_s13 = int_to_ptr.hbm [resolvable:$true] %s36_s13 }
   0x5   :  { %18 = vsyncpa [#allocation9], 0  ;;  %s611_s14 = smov [#allocation5]   ;;  %s23_s18 = sshll.u32 %s704_s0, 4  ;;  %s24_s18 = int_to_ptr.hbm [resolvable:$true] %s23_s18 }
   0x6   :  { %s38_s15 = sshll.u32 %s611_s14, 4  ;;  %s612_s19 = smov 128   ;;  %s39_s15 = int_to_ptr.vmem [resolvable:$true] %s38_s15 }
   0x7   :  { %s613_s20 = smov 8   ;;  %s614_s8 = smov [#allocation3]  }
   0x8   :  { %44 = dma.hbm_to_vmem [thread:$0]  %s37_s13, 768, %s39_s15, [#allocation6], %s612_s19, %s612_s19, %s613_s20  }
   0x9   :  { %s25_s21 = sshll.u32 %s614_s8, 4  ;;  %s615_s22 = smov 64   ;;  %s26_s21 = int_to_ptr.vmem [resolvable:$true] %s25_s21 }
   0xa   :  { %s616_s23 = smov 4   ;;  %s53_s25 = sshll.u32 %s708_s4, 4  ;;  %s54_s25 = int_to_ptr.hbm [resolvable:$true] %s53_s25 }
   0xb   :  { %31 = dma.hbm_to_vmem [thread:$0]  %s24_s18, 128, %s26_s21, [#allocation4], %s615_s22, %s615_s22, %s616_s23  }
   0xc   :  { %s617_s26 = smov [#allocation7]   ;;  %s66_s29 = sshll.u32 %s709_s5, 4  ;;  %s67_s29 = int_to_ptr.hbm [resolvable:$true] %s66_s29 }
   0xd   :  { %s55_s27 = sshll.u32 %s617_s26, 4  ;;  %s618_s30 = smov [#allocation8]   ;;  %s56_s27 = int_to_ptr.vmem [resolvable:$true] %s55_s27 }
   0xe   :  { %61 = dma.hbm_to_vmem [thread:$0]  %s54_s25, 1024, %s56_s27, [#allocation6], %s615_s22, %s615_s22, %s616_s23  }
   0xf   :  { %s68_s10 = sshll.u32 %s618_s30, 4  ;;  %s69_s10 = int_to_ptr.vmem [resolvable:$true] %s68_s10 }
  0x10   :  { %74 = dma.hbm_to_vmem [thread:$0]  %s67_s29, 1024, %s69_s10, [#allocation9], %s615_s22, %s615_s22, %s616_s23  }
  0x11   :  { %605 = dma.done.wait [#allocation4], 128  }
  0x12   :  { %606 = vsyncadd [#allocation4], 4294967168 }
  0x13   :  { %607 = dma.done.wait [#allocation6], 1792  }
  0x14   :  { %608 = vsyncadd [#allocation6], 4294965504 }
  0x15   :  { %609 = dma.done.wait [#allocation9], 1024  }
  0x16   :  { %610 = vsyncadd [#allocation9], 4294966272  ;;  %v401_v1 = vld [vmem:[#allocation5 + $0x20] sm:$0xf]  ;;  %v479_v2 = vld [vmem:[#allocation5 + $0x24] sm:$0xf0] }
  0x17   :  { %v393_v3 = vld [vmem:[#allocation5 + $0x10] sm:$0xf]  ;;  %v402_v4 = vor.u32 %v479_v2, %v401_v1  ;;  %v477_v5 = vld [vmem:[#allocation5 + $0x14] sm:$0xf0]  ;;  %v385_v6 = vld [vmem:[#allocation5] sm:$0xf] }
  0x18   :  { %v487_v7 = vld [vmem:[#allocation7 + $0x38] sm:$0xff]  ;;  %v394_v8 = vor.u32 %v477_v5, %v393_v3  ;;  %v486_v10 = vld [vmem:[#allocation7 + $0x30] sm:$0xff]  ;;  %v485_v12 = vld [vmem:[#allocation7 + $0x28] sm:$0xff]  ;;  %vm141_vm0 = vcmask 392192   ;;  %vm369_vm1 = vcmask 7168  }
  0x19   :  { %150 = vmatpush.bf16.msra.mxu0 %v402_v4  ;;  %v475_v9 = vld [vmem:[#allocation5 + $0x4] sm:$0xf0]  ;;  %246 = vmatpush.bf16.msra.mxu2 %v487_v7  ;;  %v473_v13 = vld [vmem:[#allocation3] sm:$0xff]  ;;  %v484_v14 = vld [vmem:[#allocation7 + $0x20] sm:$0xff] }
  0x1a   :  { %v386_v11 = vor.u32 %v475_v9, %v385_v6  ;;  %v483_v15 = vld [vmem:[#allocation7 + $0x18] sm:$0xff]  ;;  %v478_v16 = vld [vmem:[#allocation5 + $0x24] sm:$0xf]  ;;  %v476_v20 = vld [vmem:[#allocation5 + $0x14] sm:$0xf] }
  0x1b   :  { %v403_v17 = vld [vmem:[#allocation5 + $0x28] sm:$0xf0]  ;;  %v482_v19 = vld [vmem:[#allocation7 + $0x10] sm:$0xff]  ;;  %v395_v21 = vld [vmem:[#allocation5 + $0x18] sm:$0xf0] }
  0x1c   :  { %v406_v18 = vor.u32 %v478_v16, %v403_v17  ;;  %v398_v22 = vor.u32 %v476_v20, %v395_v21  ;;  %v481_v23 = vld [vmem:[#allocation7 + $0x8] sm:$0xff]  ;;  %v474_v24 = vld [vmem:[#allocation5 + $0x4] sm:$0xf]  ;;  %v387_v25 = vld [vmem:[#allocation5 + $0x8] sm:$0xf0] }
  0x1d   :  { %151 = vmatpush.bf16.msra.mxu0 %v394_v8  ;;  %247 = vmatpush.bf16.msra.mxu2 %v486_v10  ;;  %v390_v26 = vor.u32 %v474_v24, %v387_v25  ;;  %v480_v27 = vld [vmem:[#allocation7] sm:$0xff]  ;;  %v495_v28 = vld [vmem:[#allocation8 + $0x38] sm:$0xff]  ;;  %v494_v29 = vld [vmem:[#allocation8 + $0x30] sm:$0xff] }
  0x1e   :  { %164 = vmatpush.bf16.msra.mxu1 %v406_v18  ;;  %337 = vmatpush.bf16.msra.mxu3 %v495_v28  ;;  %v504_v31 = vld [vmem:[%s706_s2] ss:$0 sm:$0xff]  ;;  %v493_v38 = vld [vmem:[#allocation8 + $0x28] sm:$0xff]  ;;  %v491_v40 = vld [vmem:[#allocation8 + $0x18] sm:$0xff] }
  0x1f   :  { %v492_v39 = vld [vmem:[#allocation8 + $0x20] sm:$0xff]  ;;  %v490_v41 = vld [vmem:[#allocation8 + $0x10] sm:$0xff]  ;;  %v489_v42 = vld [vmem:[#allocation8 + $0x8] sm:$0xff] }
  0x20   :  { %v488_v43 = vld [vmem:[#allocation8] sm:$0xff] }
  0x21   :  { %152 = vmatpush.bf16.msra.mxu0 %v386_v11  ;;  %248 = vmatpush.bf16.msra.mxu2 %v485_v12  ;;  %v505_v47 = vld [vmem:[%s707_s3] ss:$0 sm:$0xff] }
  0x22   :  { %165 = vmatpush.bf16.msra.mxu1 %v398_v22  ;;  %338 = vmatpush.bf16.msra.mxu3 %v494_v29  ;;  %v506_v56 = vld [vmem:[%s710_s6] ss:$0 sm:$0xff] }
  0x23   :  { %v507_v59 = vld [vmem:[%s711_s7] ss:$0 sm:$0xff] }
  0x24   :  { %407 = vmatmul.msk.bf16.vlgmr.msra.gmra.mxu0 %vm141_vm0, %v473_v13  ;;  %v508_v2 = vld [vmem:[#allocation2] ss:$0 sm:$0xff] }
  0x25   :  { %249 = vmatpush.bf16.msra.mxu2 %v484_v14 }
  0x26   :  { %166 = vmatpush.bf16.msra.mxu1 %v390_v26  ;;  %339 = vmatpush.bf16.msra.mxu3 %v493_v38 }
  0x29   :  { %250 = vmatpush.bf16.msra.mxu2 %v483_v15  ;;  %408 = vmatmul.msk.bf16.vlgmr.msra.gmra.mxu1 %vm141_vm0, %v473_v13 }
  0x2a   :  { %340 = vmatpush.bf16.msra.mxu3 %v492_v39 }
  0x2d   :  { %251 = vmatpush.bf16.msra.mxu2 %v482_v19 }
  0x2e   :  { %341 = vmatpush.bf16.msra.mxu3 %v491_v40 }
  0x31   :  { %252 = vmatpush.bf16.msra.mxu2 %v481_v23 }
  0x32   :  { %342 = vmatpush.bf16.msra.mxu3 %v490_v41 }
  0x35   :  { %253 = vmatpush.bf16.msra.mxu2 %v480_v27 }
  0x36   :  { %343 = vmatpush.bf16.msra.mxu3 %v489_v42 }
  0x3a   :  { %344 = vmatpush.bf16.msra.mxu3 %v488_v43 }
  0xa1   :  { %v154_v30 = vpop.f32.mrf.mxu0 }
  0xa2   :  { %v177_v32 = vadd.f32 %v504_v31, %v154_v30 }
  0xa4   :  { %v179_v35 = vmax.f32 %v177_v32, 0.0 }
  0xa6   :  { %v168_v44 = vpop.f32.mrf.mxu1 }
  0xa9   :  { %v156_v33 = vpop.f32.mrf.mxu0 }
  0xaa   :  { %v178_v34 = vadd.f32 %v504_v31, %v156_v33 }
  0xac   :  { %v180_v36 = vmax.f32 %v178_v34, 0.0 }
  0xae   :  { %v181_v37 = vpack.c.bf16 %v180_v36, %v179_v35  ;;  %v170_v48 = vpop.f32.mrf.mxu1 }
  0xb0   :  { %254 = vmatmul.bf16.vlgmr.msra.gmra.mxu2 %v181_v37 }
 0x133   :  { %v255_v45 = vpop.f32.mrf.mxu2 }
 0x134   :  { %v256_v46 = vadd.f32 %v255_v45, %v168_v44 }
 0x136   :  { %v264_v50 = vadd.f32 %v505_v47, %v256_v46 }
 0x138   :  { %v266_v53 = vmax.f32 %v264_v50, 0.0 }
 0x13b   :  { %v257_v49 = vpop.f32.mrf.mxu2 }
 0x13c   :  { %v258_v51 = vadd.f32 %v257_v49, %v170_v48 }
 0x13e   :  { %v265_v52 = vadd.f32 %v505_v47, %v258_v51 }
 0x140   :  { %v267_v54 = vmax.f32 %v265_v52, 0.0 }
 0x142   :  { %v268_v55 = vpack.c.bf16 %v267_v54, %v266_v53 }
 0x144   :  { %345 = vmatmul.bf16.vlgmr.msra.gmra.mxu3 %v268_v55 }
 0x1c7   :  { %v346_v57 = vpop.f32.mrf.mxu3 }
 0x1c8   :  { %v347_v58 = vadd.f32 %v506_v56, %v346_v57 }
 0x1ca   :  { %v351_v60 = vmax.f32 %v347_v58, 0.0 }
 0x1cc   :  { %v357_v61 = vmul.f32 %v507_v59, %v351_v60 }
 0x1ce   :  { %359 = vadd.xlane.f32.xlu0 %v357_v61 }
 0x1cf   :  { %v348_v62 = vpop.f32.mrf.mxu3 }
 0x1d0   :  { %v349_v63 = vadd.f32 %v506_v56, %v348_v62 }
 0x1d2   :  { %v352_v0 = vmax.f32 %v349_v63, 0.0 }
 0x1d4   :  { %v358_v1 = vmul.f32 %v507_v59, %v352_v0 }
 0x1d6   :  { %361 = vadd.xlane.f32.xlu0 %v358_v1 }
 0x241   :  { %v360_v3 = vpop.xlane.xlu0 %359 }
 0x242   :  { %v367_v4 = vadd.f32 %v508_v2, %v360_v3 }
 0x244   :  { %370 = vst.msk [vmem:[%s713_s9] sm:$0xff] %vm369_vm1, %v367_v4 }
 0x249   :  { %v362_v5 = vpop.xlane.xlu0 %361 }
 0x24a   :  { %v368_v6 = vadd.f32 %v508_v2, %v362_v5 }
 0x24c   :  { %371 = vst.msk [vmem:[%s713_s9 + $0x8] sm:$0xff] %vm369_vm1, %v368_v6 }
 0x24d   :  { %376 = vsyncpa [#allocation4], 1 }
 0x24e   :  { %377 = vsyncpa [#allocation6], 1 }
 0x24f   :  { %378 = vsyncpa [#allocation9], 1 }

</bundles_post_ra>
